<compile_context>
chip_gen: v5e
topology: v5e:2x2
jax: 0.10.0
libtpu: 0.0.40
codegen_flags: <defaults>
</compile_context>

<pallas_src>
import jax
import jax.numpy as jnp
from jax.experimental import pallas as pl
from jax.experimental.pallas import tpu as pltpu


_LANE_CANDIDATES = (1024, 512, 256, 128)      # lane-dense widths (multiples of 128)
_TARGET_TILE_BYTES = 2 * 1024 * 1024          # ~2 MiB / tile -> ~8 MiB double-buffered


def _shifted_sigmoid_kernel(params_ref, x_ref, o_ref):
    # params_ref: (2,) float32 in SMEM -> [shift, scale]. Runtime scalars, so
    # changing the module parameters does not trigger a recompile.
    x = x_ref[...]
    # bf16 stays bf16 (halves vreg/VMEM pressure on v6e/v7x); everything else f32.
    cdt = jnp.bfloat16 if x.dtype == jnp.bfloat16 else jnp.float32
    shift = params_ref[0].astype(cdt)
    scale = params_ref[1].astype(cdt)
    y = jax.nn.sigmoid(x.astype(cdt) + shift) * scale
    o_ref[...] = y.astype(o_ref.dtype)


def shifted_sigmoid_activation(x, shift=0.0, scale=1.0):
    """Elementwise sigmoid(x + shift) * scale via a lane-dense Pallas TPU kernel."""
    orig_shape = x.shape
    dtype = x.dtype
    n = int(x.size)
    if n == 0:
        return x

    # Pick the largest lane width that divides the element count -> zero padding
    # (true for any NCHW tensor whose total size is a multiple of 128).
    lane = None
    for cand in _LANE_CANDIDATES:
        if n % cand == 0:
            lane = cand
            break

    x_flat = x.reshape(-1)
    if lane is None:
        # TODO(synk): element count not a multiple of 128 -> pad only the tiny
        # (<128-element) tail and slice it off afterwards.
        lane = 128
        padded_n = pl.cdiv(n, lane) * lane
        x_flat = jnp.pad(x_flat, (0, padded_n - n))
    else:
        padded_n = n

    rows = padded_n // lane

    # ~2 MiB tiles: near HBM roofline on v5e/v6e/v7x, and the 4x double-buffered
    # in+out footprint (~8 MiB) fits every generation's scoped VMEM.
    itemsize = jnp.dtype(dtype).itemsize
    target_rows = max(8, (_TARGET_TILE_BYTES // (lane * itemsize)) // 8 * 8)
    tr = min(rows, target_rows)   # multiple of 8, or == rows (full extent)

    x2 = x_flat.reshape(rows, lane)
    params = jnp.asarray([shift, scale], dtype=jnp.float32)

    # Ragged last row-block (rows % tr != 0) is handled by Pallas store masking.
    grid = (pl.cdiv(rows, tr),)

    out2 = pl.pallas_call(
        _shifted_sigmoid_kernel,
        out_shape=jax.ShapeDtypeStruct((rows, lane), dtype),
        grid_spec=pltpu.PrefetchScalarGridSpec(
            num_scalar_prefetch=0,
            grid=grid,
            in_specs=[
                pl.BlockSpec(memory_space=pltpu.MemorySpace.SMEM),  # [shift, scale]
                pl.BlockSpec((tr, lane), lambda i: (i, 0)),
            ],
            out_specs=pl.BlockSpec((tr, lane), lambda i: (i, 0)),
        ),
        compiler_params=pltpu.CompilerParams(
            dimension_semantics=("parallel",),       # lets v7x shard across both TCs
            vmem_limit_bytes=32 * 1024 * 1024,       # explicit, safe on v5e/v6e/v7x
        ),
    )(params, x2)

    out_flat = out2.reshape(-1)
    if padded_n != n:
        out_flat = out_flat[:n]
    return out_flat.reshape(orig_shape)


if __name__ == "__main__":
    key = jax.random.PRNGKey(0)
    # NCHW input, as the PyTorch module would typically see.
    x = jax.random.normal(key, (2, 4, 16, 16), dtype=jnp.float32)

    shift, scale = 0.5, 2.0  # deterministic module "parameters"

    out = shifted_sigmoid_activation(x, shift=shift, scale=scale)
    out = jax.block_until_ready(out)

    # Reference check in plain JAX.
    ref = jax.nn.sigmoid(x + shift) * scale
    assert out.shape == x.shape and out.dtype == x.dtype
    assert jnp.allclose(out, ref, atol=1e-6, rtol=1e-6)

    print("KERNEL_OK")
</pallas_src>

<mosaic_0001>
module attributes {stable_mosaic.version = 11 : i64} {
  func.func @_shifted_sigmoid_kernel(%arg0: i32, %arg1: memref<2xf32, #tpu.memory_space<smem>>, %arg2: memref<2x1024xf32, #tpu.memory_space<vmem>>, %arg3: memref<2x1024xf32, #tpu.memory_space<vmem>>) attributes {dimension_semantics = [#tpu.dimension_semantics<parallel>], iteration_bounds = array<i64: 1>, scalar_prefetch = 0 : i64, scratch_operands = 0 : i64, tpu.core_type = #tpu.core_type<tc>, window_params = [{transform_indices = @transform_0, window_bounds = array<i64: 2>}, {transform_indices = @transform_1, window_bounds = array<i64: 2, 1024>}, {transform_indices = @transform_2, window_bounds = array<i64: 2, 1024>}]} {
    %c0 = arith.constant 0 : index
    %c0_0 = arith.constant 0 : index
    %0 = vector.load %arg2[%c0, %c0_0] : memref<2x1024xf32, #tpu.memory_space<vmem>>, vector<2x1024xf32>
    %c0_1 = arith.constant 0 : index
    %1 = memref.load %arg1[%c0_1] : memref<2xf32, #tpu.memory_space<smem>>
    %c1 = arith.constant 1 : index
    %2 = memref.load %arg1[%c1] : memref<2xf32, #tpu.memory_space<smem>>
    %3 = vector.broadcast %1 : f32 to vector<2x1024xf32>
    %4 = arith.addf %0, %3 : vector<2x1024xf32>
    %5 = arith.negf %4 : vector<2x1024xf32>
    %6 = math.exp %5 : vector<2x1024xf32>
    %cst = arith.constant 1.000000e+00 : f32
    %7 = vector.broadcast %cst : f32 to vector<2x1024xf32>
    %8 = arith.addf %7, %6 : vector<2x1024xf32>
    %9 = arith.divf %7, %8 : vector<2x1024xf32>
    %10 = vector.broadcast %2 : f32 to vector<2x1024xf32>
    %11 = arith.mulf %9, %10 : vector<2x1024xf32>
    %c0_2 = arith.constant 0 : index
    %c0_3 = arith.constant 0 : index
    %12 = vector.load %arg3[%c0_2, %c0_3] : memref<2x1024xf32, #tpu.memory_space<vmem>>, vector<2x1024xf32>
    tpu.vector_store %arg3[%c0_2, %c0_3], %11 {strides = array<i32>} : memref<2x1024xf32, #tpu.memory_space<vmem>>, vector<2x1024xf32>,
    return
  }
  func.func @transform_0(%arg0: i32) -> i32 {
    %c0_i32 = arith.constant 0 : i32
    %c0_i32_0 = arith.constant 0 : i32
    return %c0_i32 : i32
  }
  func.func @transform_1(%arg0: i32) -> (i32, i32) {
    %c0_i32 = arith.constant 0 : i32
    %c0_i32_0 = arith.constant 0 : i32
    return %arg0, %c0_i32 : i32, i32
  }
  func.func @transform_2(%arg0: i32) -> (i32, i32) {
    %c0_i32 = arith.constant 0 : i32
    %c0_i32_0 = arith.constant 0 : i32
    return %arg0, %c0_i32 : i32, i32
  }
}

</mosaic_0001>

<bundles_post_ra>
// kernel: tpu_custom_call.1
= control target key start
LH: loop header
LB: loop body
LE: loop exit
PB: predicated region body
PF: predicated region fallthrough
CT: control target
= control target key end

     0   :  { %7 = vsyncpa [#allocation5], 0  ;;  %s217_s0 = inlined_call_operand.hbm [shape: f32[2], index: 0, kind: input, shape index: {}]   ;;  %s218_s1 = inlined_call_operand.hbm [shape: f32[2,1024], index: 1, kind: input, shape index: {}]   ;;  %s219_s2 = inlined_call_operand.hbm [shape: f32[2,1024], index: 2, kind: output, shape index: {}]  }
   0x1   :  { %8 = vsyncpa [#allocation3], 0 }
   0x2   :  { %9 = vsyncpa [#allocation4], 0  ;;  %s15_s11 = sshll.u32 %s217_s0, 4  ;;  %s24_s14 = sshll.u32 %s218_s1, 4  ;;  %s16_s11 = int_to_ptr.hbm [resolvable:$true] %s15_s11  ;;  %s25_s14 = int_to_ptr.hbm [resolvable:$true] %s24_s14 }
   0x3   :  { %s187_s15 = smov [#allocation2]   ;;  %s188_s16 = smov [#allocation6]  }
   0x4   :  { %18 = dma.hbm_to_smem %s16_s11, 16, %s187_s15, [#allocation5]  }
   0x5   :  { %s26_s17 = sshll.u32 %s188_s16, 4  ;;  %s27_s17 = int_to_ptr.vmem [resolvable:$true] %s26_s17 }
   0x6   :  { %29 = dma.hbm_to_vmem [thread:$0]  %s25_s14, 256, %s27_s17, [#allocation3]  }
   0x7   :  { %181 = dma.done.wait [#allocation5], 16  }
   0x8   :  { %182 = vsyncadd [#allocation5], 4294967280 }
   0x9   :  { %183 = dma.done.wait [#allocation3], 256  }
   0xa   :  { %184 = vsyncadd [#allocation3], 4294967040 }
   0xb   :  { %38 = sfence }
   0xc   :  { %s41_s18 = sld [smem:[#allocation2]]  ;;  %v39_v0 = vld [vmem:[#allocation6] sm:$0xff]  ;;  %v40_v1 = vld [vmem:[#allocation6 + $0x8] sm:$0xff]  ;;  %s189_s1 = smov [#allocation7]  }
   0xd   :  { %s211_s0 = sld [smem:[#allocation2 + $0x1]]  ;;  %s94_s19 = sshll.u32 %s189_s1, 4  ;;  %s95_s19 = int_to_ptr.vmem [resolvable:$true] %s94_s19 }
   0xe   :  { %s96_s22 = sshll.u32 %s219_s2, 4  ;;  %s97_s22 = int_to_ptr.hbm [resolvable:$true] %s96_s22 }
  0x12   :  { %v43_v2 = vstv %s41_s18 }
  0x13   :  { %v44_v3 = vadd.f32 %v43_v2, %v39_v0  ;;  %v45_v4 = vadd.f32 %v43_v2, %v40_v1  ;;  %v84_v26 = vstv %s211_s0 }
  0x15   :  { %v108_v5 = vmul.f32 -1.442695, %v44_v3  ;;  %v109_v6 = vmul.f32 -1.442695, %v45_v4 }
  0x17   :  { %113 = vpow2.f32 %v108_v5 }
  0x18   :  { %115 = vpow2.f32 %v109_v6 }
  0x1d   :  { %v114_v7 = vpop.eup %113 }
  0x1e   :  { %v116_v8 = vpop.eup %115  ;;  %v52_v9 = vadd.f32 1.0, %v114_v7 }
  0x1f   :  { %v53_v10 = vadd.f32 1.0, %v116_v8 }
  0x20   :  { %117 = vrcp.f32 %v52_v9  ;;  %vm59_vm0 = vweird.f32 %v52_v9  ;;  %v65_v14 = vand.u32 2147483648, %v52_v9  ;;  %v63_v17 = vand.u32 2147483647, %v52_v9 }
  0x21   :  { %119 = vrcp.f32 %v53_v10  ;;  %v80_v18 = vand.u32 2147483648, %v53_v10  ;;  %vm74_vm2 = vweird.f32 %v53_v10  ;;  %v78_v20 = vand.u32 2147483647, %v53_v10 }
  0x22   :  { %v66_v22 = vor.u32 1.1754944e-38, %v65_v14  ;;  %vm64_vm5 = vcmp.eq.f32.partialorder %v63_v17, 8.507059e+37 }
  0x23   :  { %v81_v25 = vor.u32 1.1754944e-38, %v80_v18  ;;  %vm79_vm7 = vcmp.eq.f32.partialorder %v78_v20, 8.507059e+37 }
  0x26   :  { %v118_v11 = vpop.eup %117 }
  0x27   :  { %v120_v12 = vpop.eup %119  ;;  %v55_v13 = vmul.f32 %v118_v11, %v52_v9  ;;  %vm60_vm1 = vweird.f32 %v118_v11 }
  0x28   :  { %v70_v15 = vmul.f32 %v120_v12, %v53_v10  ;;  %vm75_vm3 = vweird.f32 %v120_v12  ;;  %vm61_vm4 = vmor %vm59_vm0, %vm60_vm1 }
  0x29   :  { %v56_v16 = vsub.f32 1.0, %v55_v13  ;;  %vm76_vm6 = vmor %vm74_vm2, %vm75_vm3 }
  0x2a   :  { %v71_v19 = vsub.f32 1.0, %v70_v15 }
  0x2b   :  { %v57_v21 = vmul.f32 %v118_v11, %v56_v16 }
  0x2c   :  { %v72_v23 = vmul.f32 %v120_v12, %v71_v19 }
  0x2d   :  { %v58_v24 = vadd.f32 %v118_v11, %v57_v21 }
  0x2e   :  { %v73_v27 = vadd.f32 %v120_v12, %v72_v23 }
  0x2f   :  { %v62_v28 = vsel %vm61_vm4, %v118_v11, %v58_v24 }
  0x30   :  { %v67_v29 = vsel %vm64_vm5, %v66_v22, %v62_v28  ;;  %v77_v30 = vsel %vm76_vm6, %v120_v12, %v73_v27 }
  0x31   :  { %v85_v31 = vmul.f32 %v84_v26, %v67_v29  ;;  %v82_v32 = vsel %vm79_vm7, %v81_v25, %v77_v30 }
  0x32   :  { %v86_v33 = vmul.f32 %v84_v26, %v82_v32 }
  0x33   :  { %87 = vst [vmem:[#allocation7] sm:$0xff] %v85_v31 }
  0x34   :  { %88 = vst [vmem:[#allocation7 + $0x8] sm:$0xff] %v86_v33 }
  0x35   :  { %99 = dma.vmem_to_hbm [thread:$0]  %s95_s19, 256, %s97_s22, [#allocation4]  }
  0x36   :  { %185 = dma.done.wait [#allocation4], 256  }
  0x37   :  { %186 = vsyncadd [#allocation4], 4294967040 }
  0x38   :  { %104 = vsyncpa [#allocation3], 1 }
  0x39   :  { %105 = vsyncpa [#allocation4], 1 }
  0x3a   :  { %106 = vsyncpa [#allocation5], 1 }

</bundles_post_ra>
